<compile_context>
chip_gen: v6e
topology: v6e:2x2x1
jax: 0.10.0
libtpu: 0.0.40
codegen_flags: <defaults>
</compile_context>

<pallas_src>
import jax
import jax.numpy as jnp
from jax.experimental import pallas as pl
from jax.experimental.pallas import tpu as pltpu


def _round_up(x, m):
    return ((x + m - 1) // m) * m


def mlp_kernel(x_ref, w1_ref, a1_ref, w2_ref, a2_ref, w3_ref, b3_ref,
               o_ref, acc_ref):
    """One (batch-tile, k-tile) grid step.

    fc1 is accumulated over the K grid axis into the f32 VMEM scratch; the
    affine+relu+fc2+fc3 epilogue runs only on the last K step.
    """
    k = pl.program_id(1)

    @pl.when(k == 0)
    def _():
        acc_ref[...] = jnp.zeros_like(acc_ref)

    # fc1 partial product: bf16 x bf16 -> f32 accumulate on the MXU.
    acc_ref[...] += jnp.dot(x_ref[...], w1_ref[...],
                            preferred_element_type=jnp.float32)

    @pl.when(k == pl.num_programs(1) - 1)
    def _():
        # ---- layer 1 epilogue: (bias+BN folded) affine + relu (f32 VPU) ----
        h = acc_ref[...] * a1_ref[0:1, :] + a1_ref[1:2, :]
        h = jnp.maximum(h, 0.0)
        # dropout: identity (eval mode)

        # ---- layer 2: linear + affine + relu ----
        h = jnp.dot(h.astype(jnp.bfloat16), w2_ref[...],
                    preferred_element_type=jnp.float32)
        h = h * a2_ref[0:1, :] + a2_ref[1:2, :]
        h = jnp.maximum(h, 0.0)
        # dropout: identity (eval mode)

        # ---- layer 3: plain linear ----
        h = jnp.dot(h.astype(jnp.bfloat16), w3_ref[...],
                    preferred_element_type=jnp.float32)
        o_ref[...] = (h + b3_ref[...]).astype(o_ref.dtype)


def mlp_forward(x_pad, w1, a1, w2, a2, w3, b3, *, tb, tk):
    Bp, Dp = x_pad.shape
    H1p = w1.shape[1]
    H2p = w2.shape[1]
    H3p = w3.shape[1]
    grid = (Bp // tb, Dp // tk)
    return pl.pallas_call(
        mlp_kernel,
        out_shape=jax.ShapeDtypeStruct((Bp, H3p), jnp.float32),
        grid=grid,
        in_specs=[
            pl.BlockSpec((tb, tk), lambda b, k: (b, k)),      # x tile
            pl.BlockSpec((tk, H1p), lambda b, k: (k, 0)),     # w1 K-slab
            pl.BlockSpec((2, H1p), lambda b, k: (0, 0)),      # [scale1; shift1]
            pl.BlockSpec((H1p, H2p), lambda b, k: (0, 0)),    # w2 (resident)
            pl.BlockSpec((2, H2p), lambda b, k: (0, 0)),      # [scale2; shift2]
            pl.BlockSpec((H2p, H3p), lambda b, k: (0, 0)),    # w3 (resident)
            pl.BlockSpec((1, H3p), lambda b, k: (0, 0)),      # b3
        ],
        out_specs=pl.BlockSpec((tb, H3p), lambda b, k: (b, 0)),
        scratch_shapes=[pltpu.VMEM((tb, H1p), jnp.float32)],
        compiler_params=pltpu.CompilerParams(
            dimension_semantics=("parallel", "arbitrary"),
            # Budget well under v7x's 64 MiB/TC (v5e/v6e have 128 MiB).
            vmem_limit_bytes=48 * 1024 * 1024,
        ),
    )(x_pad, w1, a1, w2, a2, w3, b3)


def make_params(key, input_size):
    """Deterministic params mirroring the PyTorch module's shapes, with the
    eval-mode BN + Linear-bias fold into (scale, shift)."""
    D = input_size * input_size * 3
    H1 = input_size // 2
    H2 = input_size // 4
    H3 = input_size // 8
    eps = 1e-5
    ks = jax.random.split(key, 10)

    # torch.nn.Linear: weight (out, in), U(-1/sqrt(in), 1/sqrt(in)); store the
    # transpose (in, out) for x @ W.
    def lin(kw, kb, fin, fout):
        bound = 1.0 / float(fin) ** 0.5
        w = jax.random.uniform(kw, (fin, fout), jnp.float32, -bound, bound)
        b = jax.random.uniform(kb, (fout,), jnp.float32, -bound, bound)
        return w, b

    w1, b1 = lin(ks[0], ks[1], D, H1)
    w2, b2 = lin(ks[2], ks[3], H1, H2)
    w3, b3 = lin(ks[4], ks[5], H2, H3)

    # BN params (small deterministic perturbation of gamma/beta), running
    # stats at init (mean=0, var=1).
    g1 = 1.0 + 0.1 * jax.random.normal(ks[6], (H1,), jnp.float32)
    be1 = 0.1 * jax.random.normal(ks[7], (H1,), jnp.float32)
    g2 = 1.0 + 0.1 * jax.random.normal(ks[8], (H2,), jnp.float32)
    be2 = 0.1 * jax.random.normal(ks[9], (H2,), jnp.float32)
    rm1 = jnp.zeros((H1,), jnp.float32); rv1 = jnp.ones((H1,), jnp.float32)
    rm2 = jnp.zeros((H2,), jnp.float32); rv2 = jnp.ones((H2,), jnp.float32)

    # y = gamma * ((x@W + b) - mean) / sqrt(var+eps) + beta
    #   = (x@W) * scale + (beta + scale*(b - mean))
    s1 = g1 / jnp.sqrt(rv1 + eps)
    t1 = be1 + s1 * (b1 - rm1)
    s2 = g2 / jnp.sqrt(rv2 + eps)
    t2 = be2 + s2 * (b2 - rm2)
    return (w1, s1, t1, w2, s2, t2, w3, b3)


def pad_params(params, Dp):
    """Zero-pad weights to lane-dense (128-multiple) shapes, cast MXU operands
    to bf16, keep affines/bias in f32.  Padded lanes: scale=1, shift=0."""
    w1, s1, t1, w2, s2, t2, w3, b3 = params
    D, H1 = w1.shape
    H2 = w2.shape[1]
    H3 = w3.shape[1]
    H1p = _round_up(H1, 128)
    H2p = _round_up(H2, 128)
    H3p = _round_up(H3, 128)
    f32 = jnp.float32

    w1p = jnp.zeros((Dp, H1p), f32).at[:D, :H1].set(w1).astype(jnp.bfloat16)
    w2p = jnp.zeros((H1p, H2p), f32).at[:H1, :H2].set(w2).astype(jnp.bfloat16)
    w3p = jnp.zeros((H2p, H3p), f32).at[:H2, :H3].set(w3).astype(jnp.bfloat16)

    a1 = jnp.stack([jnp.ones((H1p,), f32).at[:H1].set(s1),
                    jnp.zeros((H1p,), f32).at[:H1].set(t1)])
    a2 = jnp.stack([jnp.ones((H2p,), f32).at[:H2].set(s2),
                    jnp.zeros((H2p,), f32).at[:H2].set(t2)])
    b3p = jnp.zeros((1, H3p), f32).at[0, :H3].set(b3)
    return (w1p, a1, w2p, a2, w3p, b3p)


def reference_forward(x_pad, w1p, a1, w2p, a2, w3p, b3p):
    """Pure-JAX reference mirroring the kernel's dtype flow."""
    f32 = jnp.float32
    h = jnp.dot(x_pad.astype(f32), w1p.astype(f32))
    h = jnp.maximum(h * a1[0:1] + a1[1:2], 0.0)
    h = jnp.dot(h.astype(jnp.bfloat16).astype(f32), w2p.astype(f32))
    h = jnp.maximum(h * a2[0:1] + a2[1:2], 0.0)
    h = jnp.dot(h.astype(jnp.bfloat16).astype(f32), w3p.astype(f32))
    return h + b3p


if __name__ == "__main__":
    input_size = 16
    B = 4
    D = input_size * input_size * 3
    H3 = input_size // 8

    key = jax.random.PRNGKey(0)
    kx, kp = jax.random.split(key)

    # NCHW input, as the PyTorch module expects before .view(B, -1)
    x = jax.random.normal(kx, (B, 3, input_size, input_size), jnp.float32)
    x_flat = x.reshape(B, -1)

    # Tile sizes (multiples of 16 sublanes / 128 lanes; re-derive per chip /
    # model size — these are tiny for the toy shapes here).
    TB = min(_round_up(B, 16), 256)
    TK = 256 if D >= 256 else _round_up(D, 128)
    Bp = _round_up(B, TB)
    Dp = _round_up(D, TK)

    params = make_params(kp, input_size)
    padded = pad_params(params, Dp)

    x_pad = (jnp.zeros((Bp, Dp), jnp.float32)
             .at[:B, :D].set(x_flat).astype(jnp.bfloat16))

    out_pad = mlp_forward(x_pad, *padded, tb=TB, tk=TK)
    out_pad = jax.block_until_ready(out_pad)
    out = out_pad[:B, :H3]

    ref = reference_forward(x_pad, *padded)[:B, :H3]
    assert out.shape == (B, H3), out.shape
    assert jnp.allclose(out, ref, atol=2e-2, rtol=2e-2), (
        float(jnp.max(jnp.abs(out - ref))))

    print("KERNEL_OK")
</pallas_src>

<mosaic_0001>
module attributes {stable_mosaic.version = 11 : i64} {
  func.func @mlp_kernel(%arg0: i32, %arg1: i32, %arg2: memref<16x256xbf16, #tpu.memory_space<vmem>>, %arg3: memref<256x128xbf16, #tpu.memory_space<vmem>>, %arg4: memref<2x128xf32, #tpu.memory_space<vmem>>, %arg5: memref<128x128xbf16, #tpu.memory_space<vmem>>, %arg6: memref<2x128xf32, #tpu.memory_space<vmem>>, %arg7: memref<128x128xbf16, #tpu.memory_space<vmem>>, %arg8: memref<1x128xf32, #tpu.memory_space<vmem>>, %arg9: memref<16x128xf32, #tpu.memory_space<vmem>>, %arg10: memref<16x128xf32, #tpu.memory_space<vmem>>) attributes {dimension_semantics = [#tpu.dimension_semantics<parallel>, #tpu.dimension_semantics<arbitrary>], iteration_bounds = array<i64: 1, 3>, scalar_prefetch = 0 : i64, scratch_operands = 1 : i64, tpu.core_type = #tpu.core_type<tc>, window_params = [{transform_indices = @transform_0, window_bounds = array<i64: 16, 256>}, {transform_indices = @transform_1, window_bounds = array<i64: 256, 128>}, {pipeline_mode = #tpu.pipeline_mode<synchronous>, transform_indices = @transform_2, window_bounds = array<i64: 2, 128>}, {pipeline_mode = #tpu.pipeline_mode<synchronous>, transform_indices = @transform_3, window_bounds = array<i64: 128, 128>}, {pipeline_mode = #tpu.pipeline_mode<synchronous>, transform_indices = @transform_4, window_bounds = array<i64: 2, 128>}, {pipeline_mode = #tpu.pipeline_mode<synchronous>, transform_indices = @transform_5, window_bounds = array<i64: 128, 128>}, {pipeline_mode = #tpu.pipeline_mode<synchronous>, transform_indices = @transform_6, window_bounds = array<i64: 1, 128>}, {transform_indices = @transform_7, window_bounds = array<i64: 16, 128>}]} {
    %c0_i32 = arith.constant 0 : i32
    %0 = arith.cmpi eq, %arg1, %c0_i32 : i32
    %1 = arith.extui %0 : i1 to i32
    %c0_i32_0 = arith.constant 0 : i32
    %2 = arith.cmpi ne, %1, %c0_i32_0 : i32
    scf.if %2 {
      %cst_9 = arith.constant 0.000000e+00 : f32
      %12 = vector.broadcast %cst_9 : f32 to vector<16x128xf32>
      %c0_10 = arith.constant 0 : index
      %c0_11 = arith.constant 0 : index
      %13 = vector.load %arg10[%c0_10, %c0_11] : memref<16x128xf32, #tpu.memory_space<vmem>>, vector<16x128xf32>
      tpu.vector_store %arg10[%c0_10, %c0_11], %12 {strides = array<i32>} : memref<16x128xf32, #tpu.memory_space<vmem>>, vector<16x128xf32>,
    } else {
    }
    %c0 = arith.constant 0 : index
    %c0_1 = arith.constant 0 : index
    %3 = vector.load %arg10[%c0, %c0_1] : memref<16x128xf32, #tpu.memory_space<vmem>>, vector<16x128xf32>
    %c0_2 = arith.constant 0 : index
    %c0_3 = arith.constant 0 : index
    %4 = vector.load %arg2[%c0_2, %c0_3] : memref<16x256xbf16, #tpu.memory_space<vmem>>, vector<16x256xbf16>
    %c0_4 = arith.constant 0 : index
    %c0_5 = arith.constant 0 : index
    %5 = vector.load %arg3[%c0_4, %c0_5] : memref<256x128xbf16, #tpu.memory_space<vmem>>, vector<256x128xbf16>
    %cst = arith.constant dense<0.000000e+00> : vector<16x128xf32>
    %6 = tpu.matmul %4, %5, %cst {dimension_numbers = #tpu.dot_dimension_numbers<[1], [0], [0], [1], [0, 0, 1, 1], [], []>} : vector<16x256xbf16>, vector<256x128xbf16>, vector<16x128xf32> -> vector<16x128xf32>
    %7 = arith.addf %3, %6 : vector<16x128xf32>
    %c0_6 = arith.constant 0 : index
    %c0_7 = arith.constant 0 : index
    %8 = vector.load %arg10[%c0_6, %c0_7] : memref<16x128xf32, #tpu.memory_space<vmem>>, vector<16x128xf32>
    tpu.vector_store %arg10[%c0_6, %c0_7], %7 {strides = array<i32>} : memref<16x128xf32, #tpu.memory_space<vmem>>, vector<16x128xf32>,
    %c2_i32 = arith.constant 2 : i32
    %9 = arith.cmpi eq, %arg1, %c2_i32 : i32
    %10 = arith.extui %9 : i1 to i32
    %c0_i32_8 = arith.constant 0 : i32
    %11 = arith.cmpi ne, %10, %c0_i32_8 : i32
    scf.if %11 {
      %c0_9 = arith.constant 0 : index
      %c0_10 = arith.constant 0 : index
      %12 = vector.load %arg10[%c0_9, %c0_10] : memref<16x128xf32, #tpu.memory_space<vmem>>, vector<16x128xf32>
      %c0_11 = arith.constant 0 : index
      %c0_12 = arith.constant 0 : index
      %13 = vector.load %arg4[%c0_11, %c0_12] : memref<2x128xf32, #tpu.memory_space<vmem>>, vector<1x128xf32>
      %14 = vector.broadcast %13 : vector<1x128xf32> to vector<16x128xf32>
      %15 = arith.mulf %12, %14 : vector<16x128xf32>
      %c1 = arith.constant 1 : index
      %c0_13 = arith.constant 0 : index
      %16 = vector.load %arg4[%c1, %c0_13] : memref<2x128xf32, #tpu.memory_space<vmem>>, vector<1x128xf32>
      %17 = vector.broadcast %16 : vector<1x128xf32> to vector<16x128xf32>
      %18 = arith.addf %15, %17 : vector<16x128xf32>
      %cst_14 = arith.constant 0.000000e+00 : f32
      %19 = vector.broadcast %cst_14 : f32 to vector<16x128xf32>
      %20 = arith.maximumf %18, %19 : vector<16x128xf32>
      %21 = arith.truncf %20 : vector<16x128xf32> to vector<16x128xbf16>
      %c0_15 = arith.constant 0 : index
      %c0_16 = arith.constant 0 : index
      %22 = vector.load %arg5[%c0_15, %c0_16] : memref<128x128xbf16, #tpu.memory_space<vmem>>, vector<128x128xbf16>
      %cst_17 = arith.constant dense<0.000000e+00> : vector<16x128xf32>
      %23 = tpu.matmul %21, %22, %cst_17 {dimension_numbers = #tpu.dot_dimension_numbers<[1], [0], [0], [1], [0, 0, 1, 1], [], []>} : vector<16x128xbf16>, vector<128x128xbf16>, vector<16x128xf32> -> vector<16x128xf32>
      %c0_18 = arith.constant 0 : index
      %c0_19 = arith.constant 0 : index
      %24 = vector.load %arg6[%c0_18, %c0_19] : memref<2x128xf32, #tpu.memory_space<vmem>>, vector<1x128xf32>
      %25 = vector.broadcast %24 : vector<1x128xf32> to vector<16x128xf32>
      %26 = arith.mulf %23, %25 : vector<16x128xf32>
      %c1_20 = arith.constant 1 : index
      %c0_21 = arith.constant 0 : index
      %27 = vector.load %arg6[%c1_20, %c0_21] : memref<2x128xf32, #tpu.memory_space<vmem>>, vector<1x128xf32>
      %28 = vector.broadcast %27 : vector<1x128xf32> to vector<16x128xf32>
      %29 = arith.addf %26, %28 : vector<16x128xf32>
      %cst_22 = arith.constant 0.000000e+00 : f32
      %30 = vector.broadcast %cst_22 : f32 to vector<16x128xf32>
      %31 = arith.maximumf %29, %30 : vector<16x128xf32>
      %32 = arith.truncf %31 : vector<16x128xf32> to vector<16x128xbf16>
      %c0_23 = arith.constant 0 : index
      %c0_24 = arith.constant 0 : index
      %33 = vector.load %arg7[%c0_23, %c0_24] : memref<128x128xbf16, #tpu.memory_space<vmem>>, vector<128x128xbf16>
      %cst_25 = arith.constant dense<0.000000e+00> : vector<16x128xf32>
      %34 = tpu.matmul %32, %33, %cst_25 {dimension_numbers = #tpu.dot_dimension_numbers<[1], [0], [0], [1], [0, 0, 1, 1], [], []>} : vector<16x128xbf16>, vector<128x128xbf16>, vector<16x128xf32> -> vector<16x128xf32>
      %c0_26 = arith.constant 0 : index
      %c0_27 = arith.constant 0 : index
      %35 = vector.load %arg8[%c0_26, %c0_27] : memref<1x128xf32, #tpu.memory_space<vmem>>, vector<1x128xf32>
      %36 = vector.broadcast %35 : vector<1x128xf32> to vector<16x128xf32>
      %37 = arith.addf %34, %36 : vector<16x128xf32>
      %c0_28 = arith.constant 0 : index
      %c0_29 = arith.constant 0 : index
      %38 = vector.load %arg9[%c0_28, %c0_29] : memref<16x128xf32, #tpu.memory_space<vmem>>, vector<16x128xf32>
      tpu.vector_store %arg9[%c0_28, %c0_29], %37 {strides = array<i32>} : memref<16x128xf32, #tpu.memory_space<vmem>>, vector<16x128xf32>,
    } else {
    }
    return
  }
  func.func @transform_0(%arg0: i32, %arg1: i32) -> (i32, i32) {
    %c0_i32 = arith.constant 0 : i32
    return %arg0, %arg1 : i32, i32
  }
  func.func @transform_1(%arg0: i32, %arg1: i32) -> (i32, i32) {
    %c0_i32 = arith.constant 0 : i32
    %c0_i32_0 = arith.constant 0 : i32
    return %arg1, %c0_i32 : i32, i32
  }
  func.func @transform_2(%arg0: i32, %arg1: i32) -> (i32, i32) {
    %c0_i32 = arith.constant 0 : i32
    %c0_i32_0 = arith.constant 0 : i32
    %c0_i32_1 = arith.constant 0 : i32
    return %c0_i32, %c0_i32_0 : i32, i32
  }
  func.func @transform_3(%arg0: i32, %arg1: i32) -> (i32, i32) {
    %c0_i32 = arith.constant 0 : i32
    %c0_i32_0 = arith.constant 0 : i32
    %c0_i32_1 = arith.constant 0 : i32
    return %c0_i32, %c0_i32_0 : i32, i32
  }
  func.func @transform_4(%arg0: i32, %arg1: i32) -> (i32, i32) {
    %c0_i32 = arith.constant 0 : i32
    %c0_i32_0 = arith.constant 0 : i32
    %c0_i32_1 = arith.constant 0 : i32
    return %c0_i32, %c0_i32_0 : i32, i32
  }
  func.func @transform_5(%arg0: i32, %arg1: i32) -> (i32, i32) {
    %c0_i32 = arith.constant 0 : i32
    %c0_i32_0 = arith.constant 0 : i32
    %c0_i32_1 = arith.constant 0 : i32
    return %c0_i32, %c0_i32_0 : i32, i32
  }
  func.func @transform_6(%arg0: i32, %arg1: i32) -> (i32, i32) {
    %c0_i32 = arith.constant 0 : i32
    %c0_i32_0 = arith.constant 0 : i32
    %c0_i32_1 = arith.constant 0 : i32
    return %c0_i32, %c0_i32_0 : i32, i32
  }
  func.func @transform_7(%arg0: i32, %arg1: i32) -> (i32, i32) {
    %c0_i32 = arith.constant 0 : i32
    %c0_i32_0 = arith.constant 0 : i32
    return %arg0, %c0_i32 : i32, i32
  }
}

</mosaic_0001>

<bundles_post_ra>
// kernel: tpu_custom_call.1
= control target key start
LH: loop header
LB: loop body
LE: loop exit
PB: predicated region body
PF: predicated region fallthrough
CT: control target
= control target key end

     0   :  { %s1700_s0 = inlined_call_operand.hbm [shape: bf16[16,768], index: 0, kind: input, shape index: {}]   ;;  %s1701_s1 = inlined_call_operand.hbm [shape: bf16[768,128], index: 1, kind: input, shape index: {}]   ;;  %s1702_s2 = inlined_call_operand.vmem [shape: f32[2,128], index: 2, kind: input, shape index: {}]   ;;  %s1703_s3 = inlined_call_operand.hbm [shape: bf16[128,128], index: 3, kind: input, shape index: {}]   ;;  %s1704_s4 = inlined_call_operand.vmem [shape: f32[2,128], index: 4, kind: input, shape index: {}]   ;;  %s1705_s5 = inlined_call_operand.hbm [shape: bf16[128,128], index: 5, kind: input, shape index: {}]   ;;  %s1706_s6 = inlined_call_operand.vmem [shape: f32[1,128], index: 6, kind: input, shape index: {}]   ;;  %s1707_s7 = inlined_call_operand.hbm [shape: f32[16,128], index: 7, kind: output, shape index: {}]  }
   0x1   :  { %1713 = sst [smem:[#allocation20_spill]] %s1700_s0 }
   0x2   :  { %1714 = sst [smem:[#allocation21_spill]] %s1703_s3 }
   0x3   :  { %1715 = sst [smem:[#allocation22_spill]] %s1705_s5 }
   0x4   :  { %1716 = sst [smem:[#allocation23_spill]] %s1707_s7 }
   0x5   :  { %12 = vsyncpa [#allocation4], 0 }
   0x6   :  { %14 = vsyncpa [#allocation4 + $0x1], 0 }
   0x7   :  { %15 = vsyncpa [#allocation7], 0 }
   0x8   :  { %17 = vsyncpa [#allocation7 + $0x1], 0 }
   0x9   :  { %18 = vsyncpa [#allocation10], 0 }
   0xa   :  { %19 = vsyncpa [#allocation5], 0  ;;  %s1482_s24 = smov 0   ;;  %s1484_s25 = smov 0  }
   0xb   :  { %s1486_s26 = smov 0   ;;  %s1488_s27 = smov 0  }
   0xc   :  { %s1490_s28 = smov 0   ;;  %s1492_s29 = smov 0  }
   0xd LB: > { %1717 = sst [smem:[#allocation17_spill]] %s1413_s26  ;;  %s1511_s30 = sadd.s32 4294967295, %s1425_s29   ;;  %s1425_s29 = sphi %s1492_s29, %s25_s29   ;;  %s1421_s28 = sphi %s1490_s28, %s1740_s28   ;;  %s1417_s27 = sphi %s1488_s27, %s1739_s27   ;;  %s1413_s26 = sphi %s1486_s26, %s1735_s26   ;;  %s1409_s25 = sphi %s1484_s25, %s1738_s25   ;;  %s1405_s24 = sphi %s1482_s24, %s1737_s24  }
   0xe   : > { %s46_s8 = sadd.s32 1, %s1413_s26  ;;  %p53_p0 = scmp.ne.s32.totalorder %s1413_s26, %s1409_s25 }
   0xf   : > { %p54_p1 = scmp.eq.s32.totalorder %s1425_s29, 0  ;;  %p59_p2 = scmp.ne.s32.totalorder %s1409_s25, %s1405_s24 }
  0x10   : > { %p1708_p3 = scmp.eq.s32.totalorder %s1511_s30, 0  ;;  %p952_p5 = scmp.ge.s32.totalorder %s1425_s29, 1 }
  0x11   : > { %p55_p4 = por %p54_p1, %p53_p0  ;;  %p227_p7 = scmp.lt.s32.totalorder %s1425_s29, 4 }
  0x12   : > { %p1522_p6 = por %p1708_p3, %p59_p2  ;;  %s1427_s11 = smov [#allocation8]  }
  0x13   : > { %p1527_p8 = pnand %p952_p5, %p227_p7  ;;  %s242_s12 = sshll.u32 %s1427_s11, 4  ;;  %s243_s12 = int_to_ptr.vmem [resolvable:$true] %s242_s12 }
  0x14   : > { %p1126_p10 = scmp.lt.s32.totalorder %s1425_s29, 3  ;;  %s1428_s15 = smov [#allocation9]  }
  0x15   : > { %p1110_p9 = pneg %p1527_p8  ;;  %s258_s16 = sshll.u32 %s1428_s15, 4  ;;  %s259_s16 = int_to_ptr.vmem [resolvable:$true] %s258_s16 }
  0x16   : > { %p1540_p12 = pnand %p1126_p10, %p55_p4  ;;  %s1238_s17 = scalar_lea.vmem %s243_s12, 1024 }
  0x17   : > { %p1536_p11 = pnand %p1110_p9, %p1708_p3  ;;  %p1239_p0 = scmp.ne.s32.totalorder %s243_s12, %s1238_s17 }
  0x18   : > { %p1246_p5 = scmp.lt.s32.totalorder %s243_s12, %s243_s12  ;;  %p1247_p7 = scmp.lt.s32.totalorder %s1238_s17, %s1238_s17 }
  0x19   : > { %p1229_p13 = pneg %p1536_p11 }
  0x1a   : > { %p1248_p9 = por %p1247_p7, %p1246_p5 }
  0x1b   : > { %p1241_p1 = pnand %p1239_p0, %p1229_p13 }
  0x1d   : > { %p1242_p2 = pneg %p1241_p1 }
  0x1f   : > { %p1249_p3 = pnand %p1248_p9, %p1242_p2 }
  0x21   : > { %1252 = shalt.err (!%p1249_p3)
}
  0x22   : > { %s1709_s18 = smov 64   ;;  %s1710_s19 = smov 4  }
  0x23   : > { %s1722_s3 = sld [smem:[#allocation21_spill]]  ;;  %s1264_s22 = scalar_lea.vmem %s259_s16, 1024 }
  0x24   : > { %p1265_p4 = scmp.ne.s32.totalorder %s259_s16, %s1264_s22  ;;  %p1272_p1 = scmp.lt.s32.totalorder %s259_s16, %s259_s16 }
  0x25   : > { %p1273_p3 = scmp.lt.s32.totalorder %s1264_s22, %s1264_s22 }
  0x26   : > { %p1267_p10 = pnand %p1265_p4, %p1229_p13 }
  0x27   : > { %p1274_p2 = por %p1273_p3, %p1272_p1 }
  0x28   : > { %p1268_p0 = pneg %p1267_p10 }
  0x29   : > { %1113 = dma.hbm_to_vmem [thread:$0]  (!%p1536_p11), %s1722_s3, 1024, %s243_s12, [#allocation7], %s1709_s18, %s1709_s18, %s1710_s19  }
  0x2a   : > { %p1275_p5 = pnand %p1274_p2, %p1268_p0 }
  0x2c   : > { %1278 = shalt.err (!%p1275_p5)
}
  0x2d   : > { %s1723_s5 = sld [smem:[#allocation22_spill]]  ;;  %s1569_s11 = sand.u32 1, %s1413_s26  }
  0x2e   : > { %s34_s12 = sadd.s32 1, %s1421_s28  ;;  %s956_s13 = sshll.u32 %s1569_s11, 4 }
  0x2f   : > { %p35_p13 = scmp.ge.s32.totalorder %s34_s12, 3  ;;  %s1012_s15 = sshll.u32 %s1421_s28, 7 }
  0x30   : > { %s1725_s0 = sld [smem:[#allocation20_spill]]  ;;  %s279_s22 = scalar_lea.vmem [#allocation3], %s956_s13 }
  0x31   : > { %s1742_s12 = smov (%p35_p13, %s34_s12), 0  ;;  %s289_s23 = sshll.u32 %s279_s22, 4  ;;  %s290_s23 = int_to_ptr.vmem [resolvable:$true] %s289_s23 }
  0x32   : > { %1724 = sst [smem:[#allocation18_spill]] %s1742_s12  ;;  %p1281_p7 = pneg %p1540_p12 }
  0x33   : > { %1116 = dma.hbm_to_vmem [thread:$0]  (!%p1536_p11), %s1723_s5, 1024, %s259_s16, [#allocation10], %s1709_s18, %s1709_s18, %s1710_s19  }
  0x34   : > { %s42_s16 = ssub.s32 %s1421_s28, %s1742_s12  ;;  %s276_s18 = scalar_lea.sflag [#allocation4], %s1569_s11 }
  0x35   : > { %p44_p11 = scmp.eq.s32.totalorder %s42_s16, 0  ;;  %s1292_s19 = scalar_lea.vmem %s290_s23, 256 }
  0x36   : > { %s1579_s21 = scalar_lea.hbm %s1725_s0, %s1012_s15  ;;  %p1293_p9 = scmp.ne.s32.totalorder %s290_s23, %s1292_s19 }
  0x37   : > { %s1586_s24 = scalar_select %p44_p11, %s1413_s26, %s46_s8  }
  0x38   : > { %p1295_p4 = pnand %p1293_p9, %p1281_p7  ;;  %s1431_s17 = smov [#allocation3]  }
  0x39   : > { %1726 = sst [smem:[#allocation19_spill]] %s1586_s24  ;;  %s1297_s15 = sshll.u32 %s1431_s17, 4  ;;  %s1298_s15 = int_to_ptr.vmem [resolvable:$false] %s1297_s15 }
  0x3a   : > { %p1296_p10 = pneg %p1295_p4  ;;  %s1299_s13 = scalar_lea.vmem %s1298_s15, 512 }
  0x3b   : > { %p1300_p0 = scmp.lt.s32.totalorder %s290_s23, %s1298_s15  ;;  %p1301_p1 = scmp.lt.s32.totalorder %s1299_s13, %s1292_s19 }
  0x3d   : > { %p1302_p3 = por %p1301_p1, %p1300_p0 }
  0x3f   : > { %p1303_p2 = pnand %p1302_p3, %p1296_p10 }
  0x41   : > { %1306 = shalt.err (!%p1303_p2)
}
  0x42   : > { %s1432_s8 = smov 384   ;;  %s1433_s20 = smov 128  }
  0x43   : > { %s1434_s22 = smov 8   ;;  %s299_s16 = sand.u32 1, %s1425_s29  }
  0x44   : > { %1120 = dma.hbm_to_vmem [thread:$0]  (!%p1540_p12), %s1579_s21, 256, %s290_s23, %s276_s18, %s1432_s8, %s1433_s20, %s1434_s22  }
  0x45   : > { %s959_s17 = sshll.u32 %s1569_s11, 7  ;;  %s1013_s0 = sshll.u32 %s1421_s28, 11 }
  0x46   : > { %s303_s3 = scalar_lea.vmem [#allocation6], %s959_s17  ;;  %s309_s5 = scalar_lea.hbm %s1701_s1, %s1013_s0 }
  0x47   : > { %s310_s15 = sshll.u32 %s303_s3, 4  ;;  %s300_s12 = scalar_lea.sflag [#allocation7], %s299_s16  ;;  %s311_s15 = int_to_ptr.vmem [resolvable:$true] %s310_s15 }
  0x48   : > { %s1320_s24 = scalar_lea.vmem %s311_s15, 2048  ;;  %s1435_s26 = smov [#allocation6]  }
  0x49   : > { %p1321_p5 = scmp.ne.s32.totalorder %s311_s15, %s1320_s24  ;;  %s1325_s7 = sshll.u32 %s1435_s26, 4  ;;  %s1326_s7 = int_to_ptr.vmem [resolvable:$false] %s1325_s7 }
  0x4a   : > { %s1327_s18 = scalar_lea.vmem %s1326_s7, 4096  ;;  %p1328_p9 = scmp.lt.s32.totalorder %s311_s15, %s1326_s7 }
  0x4b   : > { %p1323_p13 = pnand %p1321_p5, %p1281_p7  ;;  %p1329_p4 = scmp.lt.s32.totalorder %s1327_s18, %s1320_s24 }
  0x4d   : > { %p1324_p11 = pneg %p1323_p13  ;;  %p1330_p10 = por %p1329_p4, %p1328_p9 }
  0x4f   : > { %p1331_p0 = pnand %p1330_p10, %p1324_p11 }
  0x51   : > { %1334 = shalt.err (!%p1331_p0)
}
  0x52   : > { %s1727_s0 = smov 4   ;;  %s1728_s3 = smov 64  }
  0x53   : > { %1123 = dma.hbm_to_vmem [thread:$0]  (!%p1540_p12), %s309_s5, 2048, %s311_s15, %s300_s12, %s1728_s3, %s1728_s3, %s1727_s0  }
  0x54   : > { %322 = sbr.rel (%p1527_p8) target bundleno = 805 (0x325), region = 48  ;;  %s324_s11 = sand.u32 (!%p1527_p8), 1, %s1409_s25  }
  0x55   : > { %s963_s26 = sshll.u32 (!%p1527_p8), %s324_s11, 4  ;;  %s325_s21 = scalar_lea.sflag (!%p1527_p8), [#allocation4], %s324_s11 }
  0x56   : > { %s1614_s23 = scalar_lea.vmem (!%p1527_p8), [#allocation3], %s963_s26 }
  0x59   : > { %1384 = dma.done.wait (%p1522_p6), %s325_s21, 256  }
  0x5a   : > { %1386 = vsyncadd (%p1522_p6), %s325_s21, 4294967040  ;;  %s333_s7 = sand.u32 1, %s1511_s30   ;;  %s964_s14 = sshll.u32 %s324_s11, 7 }
  0x5b   : > { %s334_s5 = scalar_lea.sflag [#allocation7], %s333_s7  ;;  %s1621_s12 = scalar_lea.vmem [#allocation6], %s964_s14 }
  0x5c   : > { %1388 = dma.done.wait (%p1522_p6), %s334_s5, 2048  }
  0x5d   : > { %1390 = vsyncadd (%p1522_p6), %s334_s5, 4294965248  ;;  %p1729_p8 = scmp.eq.s32.totalorder %s1511_s30, 0 }
  0x5f   : > { %1392 = dma.done.wait (%p1729_p8), [#allocation7], 1024   ;;  %p1730_p12 = pmov %p1729_p8 }
  0x60   : > { %p1731_p7 = pmov %p1729_p8 }
  0x61   : > { %1394 = vsyncadd (%p1730_p12), [#allocation7], 4294966272 }
  0x62   : > { %1396 = dma.done.wait (%p1731_p7), [#allocation10], 1024   ;;  %p1732_p1 = pmov %p1731_p7 }
  0x63   : > { %p967_p3 = scmp.ne.s32.totalorder %s1417_s27, 0 }
  0x64   : > { %1398 = vsyncadd (%p1732_p1), [#allocation10], 4294966272 }
  0x65   : > { %384 = sbr.rel (%p967_p3) target bundleno = 108 (0x6c), region = 68 }
  0x6a   : > { %v1436_v0 = vmov 0.0  }
  0x6b   : > { %385 = vst [vmem:[#allocation2] sm:$0xff] %v1436_v0  ;;  %386 = vst [vmem:[#allocation2 + $0x8] sm:$0xff] %v1436_v0 }
  0x6c PF: > { %v1192_v1 = vld [vmem:[%s1621_s12 + $0x78] sm:$0xff]   ;;  %v1194_v3 = vld [vmem:[%s1621_s12 + $0x70] sm:$0xff]   ;;  %v1196_v5 = vld [vmem:[%s1621_s12 + $0x68] sm:$0xff]   ;;  %p986_p6 = scmp.ne.s32.totalorder %s1417_s27, 2 }
  0x6d   : > { %v1193_v2 = vld [vmem:[%s1621_s12 + $0x38] sm:$0xff]   ;;  %1014 = vmatprep.subr.bf16.mxu0 %v1192_v1  ;;  %v1195_v4 = vld [vmem:[%s1621_s12 + $0x30] sm:$0xff]   ;;  %v1197_v6 = vld [vmem:[%s1621_s12 + $0x28] sm:$0xff]  }
  0x6e   : > { %1015 = vmatpush3.bf16.msra.mxu0 %v1193_v2  ;;  %v1198_v7 = vld [vmem:[%s1621_s12 + $0x60] sm:$0xff]   ;;  %v1200_v9 = vld [vmem:[%s1621_s12 + $0x58] sm:$0xff]   ;;  %v1202_v11 = vld [vmem:[%s1621_s12 + $0x50] sm:$0xff]  }
  0x6f   : > { %1016 = vmatprep.subr.bf16.mxu0 %v1194_v3  ;;  %v1199_v8 = vld [vmem:[%s1621_s12 + $0x20] sm:$0xff]   ;;  %v1201_v10 = vld [vmem:[%s1621_s12 + $0x18] sm:$0xff]   ;;  %v1203_v13 = vld [vmem:[%s1621_s12 + $0x10] sm:$0xff]  }
  0x70   : > { %v1210_v12 = vld [vmem:[%s1614_s23 + $0x4] ss:$8 sps:$4 sm:$0xff]   ;;  %v1208_v18 = vld [vmem:[%s1614_s23] ss:$8 sps:$4 sm:$0xff]  }
  0x71   : > { %561 = vmatprep.mubr.bf16.mxu0 %v1210_v12  ;;  %v1204_v14 = vld [vmem:[%s1621_s12 + $0x48] sm:$0xff]   ;;  %v1206_v16 = vld [vmem:[%s1621_s12 + $0x40] sm:$0xff]  }
  0x72   : > { %1017 = vmatpush3.bf16.msra.mxu0 %v1195_v4  ;;  %v1205_v15 = vld [vmem:[%s1621_s12 + $0x8] sm:$0xff]   ;;  %v1207_v17 = vld [vmem:[%s1621_s12] sm:$0xff]   ;;  %v387_v20 = vld [vmem:[#allocation2] sm:$0xff] }
  0x73   : > { %1018 = vmatprep.subr.bf16.mxu0 %v1196_v5  ;;  %v388_v25 = vld [vmem:[#allocation2 + $0x8] sm:$0xff] }
  0x76   : > { %1019 = vmatpush3.bf16.msra.mxu0 %v1197_v6 }
  0x77   : > { %1020 = vmatprep.subr.bf16.mxu0 %v1198_v7 }
  0x7a   : > { %1021 = vmatpush3.bf16.msra.mxu0 %v1199_v8 }
  0x7b   : > { %1022 = vmatprep.subr.bf16.mxu0 %v1200_v9 }
  0x7e   : > { %1023 = vmatpush3.bf16.msra.mxu0 %v1201_v10 }
  0x7f   : > { %1024 = vmatprep.subr.bf16.mxu0 %v1202_v11 }
  0x82   : > { %1025 = vmatpush3.bf16.msra.mxu0 %v1203_v13 }
  0x83   : > { %1026 = vmatprep.subr.bf16.mxu0 %v1204_v14 }
  0x86   : > { %1027 = vmatpush3.bf16.msra.mxu0 %v1205_v15 }
  0x87   : > { %1028 = vmatprep.subr.bf16.mxu0 %v1206_v16 }
  0x8a   : > { %1029 = vmatpush3.bf16.msra.mxu0 %v1207_v17 }
  0x8d   : > { %562 = vmatmul.mubr.bf16.vlgmr.msra.gmra.mxu0 %v1208_v18 }
 0x14d   : > { %v1030_v19 = vpop.f32.mrf.mxu0 }
 0x14f   : > { %v1031_v21 = vpop.f32.mrf.mxu0 }
 0x150   : > { %v1032_v22 = vadd.f32 %v1031_v21, %v1030_v19 }
 0x151   : > { %v1033_v23 = vpop.f32.mrf.mxu0 }
 0x152   : > { %v570_v24 = vadd.f32 %v1032_v22, %v387_v20 }
 0x153   : > { %v1034_v26 = vpop.f32.mrf.mxu0 }
 0x154   : > { %572 = vst [vmem:[#allocation2] sm:$0xff] %v570_v24  ;;  %v1035_v27 = vadd.f32 %v1034_v26, %v1033_v23  ;;  %577 = sbr.rel (%p986_p6) target bundleno = 783 (0x30f), region = 72 }
 0x156   : > { %v571_v28 = vadd.f32 %v1035_v27, %v388_v25 }
 0x158   : > { %573 = vst [vmem:[#allocation2 + $0x8] sm:$0xff] %v571_v28 }
 0x159   : > { %v1211_v29 = vld [vmem:[#allocation8 + $0x38] sm:$0xff]   ;;  %v1437_v30 = vmov 0.0   ;;  %v1212_v31 = vld [vmem:[#allocation8 + $0x30] sm:$0xff]   ;;  %vm1438_vm0 = vmmov 0   ;;  %v1213_v32 = vld [vmem:[#allocation8 + $0x28] sm:$0xff]  }
 0x15a   : > { %1054 = vmatprep.subr.bf16.mxu0 %v1437_v30  ;;  %1074 = vmatprep.subr.bf16.mxu1 %v1437_v30  ;;  %v1214_v33 = vld [vmem:[#allocation8 + $0x20] sm:$0xff]   ;;  %v1219_v34 = vld [vmem:[#allocation9 + $0x38] sm:$0xff]   ;;  %v1220_v37 = vld [vmem:[#allocation9 + $0x30] sm:$0xff]  }
 0x15b   : > { %1055 = vmatpush3.bf16.msra.mxu0 %v1211_v29  ;;  %1070 = vmatprep.mubr.msk.bf16.mxu0 %vm1438_vm0, %v1437_v30  ;;  %v1215_v35 = vld [vmem:[#allocation8 + $0x18] sm:$0xff]   ;;  %v578_v36 = vld [vmem:[#allocation2] sm:$0xff]  ;;  %v1221_v40 = vld [vmem:[#allocation9 + $0x28] sm:$0xff]  }
 0x15c   : > { %1056 = vmatprep.subr.bf16.mxu0 %v1437_v30  ;;  %1090 = vmatprep.mubr.msk.bf16.mxu1 %vm1438_vm0, %v1437_v30  ;;  %v987_v39 = vld [vmem:[%s1702_s2] ss:$0 sm:$0xff]  ;;  %v988_v44 = vld [vmem:[%s1702_s2 + $0x1] ss:$0 sm:$0xff]  ;;  %v1222_v45 = vld [vmem:[#allocation9 + $0x20] sm:$0xff]  }
 0x15d   : > { %1075 = vmatpush3.bf16.msra.mxu1 %v1219_v34  ;;  %v585_v41 = vmul.f32 %v987_v39, %v578_v36  ;;  %v1216_v43 = vld [vmem:[#allocation8 + $0x10] sm:$0xff]   ;;  %v1217_v48 = vld [vmem:[#allocation8 + $0x8] sm:$0xff]   ;;  %v1223_v49 = vld [vmem:[#allocation9 + $0x18] sm:$0xff]  }
 0x15e   : > { %1076 = vmatprep.subr.bf16.mxu1 %v1437_v30  ;;  %v1218_v52 = vld [vmem:[#allocation8] sm:$0xff]   ;;  %v1224_v54 = vld [vmem:[#allocation9 + $0x10] sm:$0xff]   ;;  %v1225_v55 = vld [vmem:[#allocation9 + $0x8] sm:$0xff]  }
 0x15f   : > { %1057 = vmatpush3.bf16.msra.mxu0 %v1212_v31  ;;  %v579_v38 = vld [vmem:[#allocation2 + $0x8] sm:$0xff]  ;;  %v592_v46 = vadd.f32 %v988_v44, %v585_v41  ;;  %v1226_v56 = vld [vmem:[#allocation9] sm:$0xff]   ;;  %v997_v57 = vld [vmem:[%s1704_s4] ss:$0 sm:$0xff] }
 0x160   : > { %1058 = vmatprep.subr.bf16.mxu0 %v1437_v30  ;;  %v586_v42 = vmul.f32 %v987_v39, %v579_v38  ;;  %v998_v60 = vld [vmem:[%s1704_s4 + $0x1] ss:$0 sm:$0xff]  ;;  %v999_v6 = vld [vmem:[%s1706_s6] ss:$0 sm:$0xff] }
 0x161   : > { %1077 = vmatpush3.bf16.msra.mxu1 %v1220_v37  ;;  %v594_v50 = vmax.f32 %v592_v46, 0.0 }
 0x162   : > { %1078 = vmatprep.subr.bf16.mxu1 %v1437_v30  ;;  %v593_v47 = vadd.f32 %v988_v44, %v586_v42 }
 0x163   : > { %1059 = vmatpush3.bf16.msra.mxu0 %v1213_v32 }
 0x164   : > { %1060 = vmatprep.subr.bf16.mxu0 %v1437_v30  ;;  %v595_v51 = vmax.f32 %v593_v47, 0.0 }
 0x165   : > { %1079 = vmatpush3.bf16.msra.mxu1 %v1221_v40 }
 0x166   : > { %1080 = vmatprep.subr.bf16.mxu1 %v1437_v30  ;;  %v596_v53 = vpack.c.bf16 %v595_v51, %v594_v50 }
 0x167   : > { %1061 = vmatpush3.bf16.msra.mxu0 %v1214_v33 }
 0x168   : > { %1062 = vmatprep.subr.bf16.mxu0 %v1437_v30 }
 0x169   : > { %1081 = vmatpush3.bf16.msra.mxu1 %v1222_v45 }
 0x16a   : > { %1082 = vmatprep.subr.bf16.mxu1 %v1437_v30 }
 0x16b   : > { %1063 = vmatpush3.bf16.msra.mxu0 %v1215_v35 }
 0x16c   : > { %1064 = vmatprep.subr.bf16.mxu0 %v1437_v30 }
 0x16d   : > { %1083 = vmatpush3.bf16.msra.mxu1 %v1223_v49 }
 0x16e   : > { %1084 = vmatprep.subr.bf16.mxu1 %v1437_v30 }
 0x16f   : > { %1065 = vmatpush3.bf16.msra.mxu0 %v1216_v43 }
 0x170   : > { %1066 = vmatprep.subr.bf16.mxu0 %v1437_v30 }
 0x171   : > { %1085 = vmatpush3.bf16.msra.mxu1 %v1224_v54 }
 0x172   : > { %1086 = vmatprep.subr.bf16.mxu1 %v1437_v30 }
 0x173   : > { %1067 = vmatpush3.bf16.msra.mxu0 %v1217_v48 }
 0x174   : > { %1068 = vmatprep.subr.bf16.mxu0 %v1437_v30 }
 0x175   : > { %1087 = vmatpush3.bf16.msra.mxu1 %v1225_v55 }
 0x176   : > { %1088 = vmatprep.subr.bf16.mxu1 %v1437_v30 }
 0x177   : > { %1069 = vmatpush3.bf16.msra.mxu0 %v1218_v52 }
 0x179   : > { %1089 = vmatpush3.bf16.msra.mxu1 %v1226_v56 }
 0x17a   : > { %1071 = vmatmul.mubr.bf16.vlgmr.msra.gmra.mxu0 %v596_v53 }
 0x23a   : > { %v695_v58 = vpop.f32.mrf.mxu0 }
 0x23b   : > { %v707_v59 = vmul.f32 %v997_v57, %v695_v58 }
 0x23c   : > { %v1072_v61 = vpop.f32.mrf.mxu0 }
 0x23d   : > { %v714_v63 = vadd.f32 %v998_v60, %v707_v59 }
 0x23e   : > { %v698_v62 = vpop.f32.mrf.mxu0 }
 0x23f   : > { %v708_v0 = vmul.f32 %v997_v57, %v698_v62  ;;  %v716_v3 = vmax.f32 %v714_v63, 0.0 }
 0x240   : > { %v1073_v1 = vpop.f32.mrf.mxu0 }
 0x241   : > { %v715_v2 = vadd.f32 %v998_v60, %v708_v0 }
 0x243   : > { %v717_v4 = vmax.f32 %v715_v2, 0.0 }
 0x245   : > { %v718_v5 = vpack.c.bf16 %v717_v4, %v716_v3 }
 0x247   : > { %1091 = vmatmul.mubr.bf16.vlgmr.msra.gmra.mxu1 %v718_v5 }
 0x307   : > { %v824_v7 = vpop.f32.mrf.mxu1 }
 0x308   : > { %v825_v8 = vadd.f32 %v999_v6, %v824_v7 }
 0x309   : > { %v1092_v9 = vpop.f32.mrf.mxu1 }
 0x30a   : > { %831 = vst [vmem:[#allocation11] sm:$0xff] %v825_v8 }
 0x30b   : > { %v827_v10 = vpop.f32.mrf.mxu1 }
 0x30c   : > { %v828_v11 = vadd.f32 %v999_v6, %v827_v10 }
 0x30d   : > { %v1093_v12 = vpop.f32.mrf.mxu1 }
 0x30e   : > { %832 = vst [vmem:[#allocation11 + $0x8] sm:$0xff] %v828_v11 }
 0x30f PF: > { %p1129_p2 = scmp.eq.s32.totalorder %s1511_s30, 2  ;;  %s1439_s19 = smov [#allocation11]  }
 0x310   : > { %s842_s13 = sshll.u32 %s1439_s19, 4  ;;  %s843_s13 = int_to_ptr.vmem [resolvable:$true] %s842_s13 }
 0x311   : > { %s1335_s18 = scalar_lea.vmem %s843_s13, 256  ;;  %p1342_p9 = scmp.lt.s32.totalorder %s843_s13, %s843_s13 }
 0x312   : > { %p1336_p5 = scmp.ne.s32.totalorder %s843_s13, %s1335_s18  ;;  %p1343_p4 = scmp.lt.s32.totalorder %s1335_s18, %s1335_s18 }
 0x314   : > { %p1337_p13 = pnand %p1336_p5, %p1129_p2  ;;  %p1344_p10 = por %p1343_p4, %p1342_p9 }
 0x316   : > { %p1338_p11 = pneg %p1337_p13 }
 0x318   : > { %p1345_p0 = pnand %p1344_p10, %p1338_p11 }
 0x31a   : > { %1348 = shalt.err (!%p1345_p0)
}
 0x31b   : > { %s1440_s0 = smov 128   ;;  %s1441_s3 = smov 8  }
 0x31c   : > { %s1733_s21 = sld [smem:[#allocation23_spill]] }
 0x322   : > { %1107 = dma.vmem_to_hbm [thread:$0]  (%p1129_p2), %s843_s13, 256, %s1733_s21, [#allocation5], %s1440_s0, %s1440_s0, %s1441_s3  }
 0x323   : > { %1400 = dma.done.wait (%p1129_p2), [#allocation5], 256  }
 0x324   : > { %1402 = vsyncadd (%p1129_p2), [#allocation5], 4294967040 }
 0x325 PF: > { %s25_s29 = sadd.s32 1, %s1425_s29   ;;  %s1734_s23 = sld [smem:[#allocation17_spill]] }
 0x326   : > { %p22_p8 = scmp.ge.s32.totalorder %s25_s29, 5   ;;  %s1735_s26 = sld [smem:[#allocation19_spill]] }
 0x327   : > { %s1736_s7 = sld [smem:[#allocation18_spill]]  ;;  %s1737_s24 = smov %s1409_s25 }
 0x328   : > { %s1739_s27 = smov %s1421_s28 }
 0x329   :  { %24 = sbr.rel (!%p22_p8) target bundleno = 13 (0xd), region = 115 }
 0x32b   : > { %s1738_s25 = smov %s1734_s23 }
 0x32d   : > { %s1740_s28 = smov %s1736_s7 }
 0x32e   :  { %858 = vsyncpa [#allocation4], 1 }
 0x32f   :  { %860 = vsyncpa [#allocation4 + $0x1], 1 }
 0x330   :  { %861 = vsyncpa [#allocation7], 1 }
 0x331   :  { %863 = vsyncpa [#allocation7 + $0x1], 1 }
 0x332   :  { %864 = vsyncpa [#allocation10], 1 }
 0x333   :  { %865 = vsyncpa [#allocation5], 1 }
 0x334   :  { %867 = vsyncpa [#allocation5 + $0x1], 1 }

</bundles_post_ra>
